<compile_context>
chip_gen: v5e
topology: v5e:2x2
jax: 0.10.0
libtpu: 0.0.40
codegen_flags: <defaults>
</compile_context>

<pallas_src>
import functools

import jax
import jax.numpy as jnp
from jax import lax
from jax.experimental import pallas as pl
from jax.experimental.pallas import tpu as pltpu

EPS = 1e-5  # torch.nn.InstanceNorm2d default (affine=False, eps=1e-5)


@functools.lru_cache(maxsize=None)
def _pltpu_roll_sign():
    """+1 if pltpu.roll matches jnp.roll (out[i] = x[i - shift]), else -1.

    One trivial cached probe kernel; guards the main kernel against a
    rotate-direction convention difference across jax/libtpu versions.
    Call eagerly (it is cached); warm the cache before jitting the wrapper.
    """
    def probe(x_ref, o_ref):
        o_ref[...] = pltpu.roll(x_ref[...], 1, 1)

    x = jnp.tile(lax.iota(jnp.float32, 128)[None, :], (8, 1))
    y = pl.pallas_call(
        probe, out_shape=jax.ShapeDtypeStruct((8, 128), jnp.float32))(x)
    return 1 if int(y[0, 0]) == 127 else -1


def _reflect_taps(z, *, k, H, W, i_idx, j_idx, roll_sign):
    """im2col patches for a k x k conv with PyTorch 'reflect' padding.

    z: (R, H*W) -- each row is one flattened (sample, channel) image,
    lane-dense.  Returns (k*k*R, H*W) with tap order (kh, kw) outer->inner,
    matching HWIO weight layout.  Built purely from pltpu.roll + masks.
    """
    hw = z.shape[-1]
    p = k // 2

    def rolled(base, step):
        # views[d][r, q] = base[r, (q + d*step) mod hw]   (cyclic; borders fixed below)
        views = {0: base}
        for d in range(1, p + 1):
            views[d] = pltpu.roll(base, (roll_sign * (-d * step)) % hw, 1)
            views[-d] = pltpu.roll(base, (roll_sign * (d * step)) % hw, 1)
        return views

    def pick(views, d, size, idx):
        # Read logical index (idx + d) with 'reflect' boundary handling.
        out = views[d]
        if d < 0:
            for t in range(-d):                       # positions with t + d < 0
                src = -(t + d)
                out = jnp.where(idx == t, views[src - t], out)
        elif d > 0:
            for t in range(size - d, size):           # positions with t + d > size-1
                src = 2 * (size - 1) - (t + d)
                out = jnp.where(idx == t, views[src - t], out)
        return out

    row_views = rolled(z, W)
    taps = []
    for dy in range(-p, p + 1):                       # kh = dy + p
        shifted_rows = pick(row_views, dy, H, i_idx)
        col_views = rolled(shifted_rows, 1)
        for dx in range(-p, p + 1):                   # kw = dx + p
            taps.append(pick(col_views, dx, W, j_idx))
    # Concat of full-8-sublane (R, H*W) blocks along the sublane axis: no shuffles.
    return jnp.concatenate(taps, axis=0)              # (k*k*R, H*W)


def _conv_instnorm(z, wb, b_col, *, k, H, W, i_idx, j_idx, roll_sign, relu):
    """Conv(k, reflect) + InstanceNorm2d (+ optional ReLU) on (N*C, H*W) data."""
    patches = _reflect_taps(z, k=k, H=H, W=W, i_idx=i_idx, j_idx=j_idx,
                            roll_sign=roll_sign)
    # One MXU matmul per stage for the whole batch (block-diagonal weight).
    y = jnp.dot(wb, patches, preferred_element_type=jnp.float32) + b_col

    # InstanceNorm2d (affine=False): single pass, var = E[y^2] - mean^2,
    # biased variance over H*W lanes (matches PyTorch).
    inv_hw = 1.0 / (H * W)
    s1 = jnp.sum(y, axis=1, keepdims=True)
    s2 = jnp.sum(y * y, axis=1, keepdims=True)
    mean = s1 * inv_hw
    var = s2 * inv_hw - mean * mean
    y = (y - mean) * lax.rsqrt(var + EPS)
    if relu:
        y = jnp.maximum(y, 0.0)
    return y                                          # (N*C, H*W)


def _residual_block_kernel(x_ref, i_ref, j_ref, wb1_ref, b1_ref, wb2_ref,
                           b2_ref, o_ref, *, k, H, W, roll_sign):
    x = x_ref[...]                                    # (N*C, H*W), lane-dense
    i_idx = i_ref[...]                                # row index of each lane
    j_idx = j_ref[...]                                # col index of each lane
    common = dict(k=k, H=H, W=W, i_idx=i_idx, j_idx=j_idx, roll_sign=roll_sign)

    h = _conv_instnorm(x, wb1_ref[...], b1_ref[...], relu=True, **common)
    y = _conv_instnorm(h, wb2_ref[...], b2_ref[...], relu=False, **common)

    # Residual add; (8, 256) output = two full unmasked vreg stores.
    o_ref[...] = (x + y).astype(o_ref.dtype)


def _pack_weights(w_hwio, bias, N, C, k):
    """Block-diagonal im2col weight: WB[(n,o), (t,m,c)] = w[kh,kw,c,o] * (n==m)."""
    w_otc = jnp.transpose(w_hwio, (3, 0, 1, 2)).reshape(C, k * k, C)  # (o, t, c)
    wb = jnp.einsum("otc,nm->notmc", w_otc.astype(jnp.float32),
                    jnp.eye(N, dtype=jnp.float32))
    wb = wb.reshape(N * C, k * k * N * C)
    b_col = jnp.tile(bias.astype(jnp.float32).reshape(1, C), (N, 1)).reshape(N * C, 1)
    return wb, b_col


def residual_block_forward(inputs, w1, b1, w2, b2):
    """Pallas equivalent of ResidualBlock.forward.

    inputs = (x_nchw, skip_list, index); conv weights are HWIO (k, k, Cin, Cout).
    Returns (x + block(x), skip_list, index) in NCHW (float32, torch default).
    """
    x, skip_list, index = inputs
    x = x.astype(jnp.float32)
    N, C, H, W = x.shape
    k = w1.shape[0]
    p = k // 2
    assert k % 2 == 1, "kernel_size must be odd"
    assert p < H and p < W, "'reflect' padding requires kernel_size//2 < H, W"

    wb1, b1c = _pack_weights(w1, b1, N, C, k)
    wb2, b2c = _pack_weights(w2, b2, N, C, k)

    # Lane-dense layout for the kernel: contiguous (free) reshape.
    x2 = x.reshape(N * C, H * W)
    pos = jnp.arange(H * W, dtype=jnp.int32)
    i_idx = jnp.broadcast_to(pos // W, (N * C, H * W))
    j_idx = jnp.broadcast_to(pos % W, (N * C, H * W))

    kernel = functools.partial(_residual_block_kernel, k=k, H=H, W=W,
                               roll_sign=_pltpu_roll_sign())

    vmem = pl.BlockSpec(memory_space=pltpu.MemorySpace.VMEM)
    out = pl.pallas_call(
        kernel,
        out_shape=jax.ShapeDtypeStruct((N * C, H * W), jnp.float32),
        in_specs=[vmem] * 7,
        out_specs=vmem,
    )(x2, i_idx, j_idx, wb1, b1c, wb2, b2c)

    # Contiguous (free) reshape back to NCHW.
    return out.reshape(N, C, H, W), skip_list, index


def _reference_forward(x, w1, b1, w2, b2):
    """Pure-JAX reference (lax.conv, NCHW) for correctness checking."""
    def conv_in(x, w, b):
        p = w.shape[0] // 2
        xp = jnp.pad(x, ((0, 0), (0, 0), (p, p), (p, p)), mode="reflect")
        y = lax.conv_general_dilated(
            xp, w, window_strides=(1, 1), padding="VALID",
            dimension_numbers=("NCHW", "HWIO", "NCHW")) + b.reshape(1, -1, 1, 1)
        mean = jnp.mean(y, axis=(2, 3), keepdims=True)
        var = jnp.mean((y - mean) ** 2, axis=(2, 3), keepdims=True)
        return (y - mean) * lax.rsqrt(var + EPS)

    h = jnp.maximum(conv_in(x, w1, b1), 0.0)
    return x + conv_in(h, w2, b2)


if __name__ == "__main__":
    # Small shapes consistent with the module: batch=2, channels=4, 16x16, k=3.
    N, C, H, W, K = 2, 4, 16, 16, 3

    key = jax.random.PRNGKey(0)
    kx, kw1, kb1, kw2, kb2 = jax.random.split(key, 5)

    x = jax.random.normal(kx, (N, C, H, W), dtype=jnp.float32)

    # Conv2d params stored as HWIO = (k, k, Cin, Cout), default-uniform init.
    fan_in = C * K * K
    bound = 1.0 / jnp.sqrt(fan_in)
    w1 = jax.random.uniform(kw1, (K, K, C, C), jnp.float32, -bound, bound)
    b1 = jax.random.uniform(kb1, (C,), jnp.float32, -bound, bound)
    w2 = jax.random.uniform(kw2, (K, K, C, C), jnp.float32, -bound, bound)
    b2 = jax.random.uniform(kb2, (C,), jnp.float32, -bound, bound)

    skip_list = [jnp.zeros((1,), jnp.float32)]  # passed through untouched
    index = 0                                   # passed through untouched

    out, skip_out, idx_out = residual_block_forward(
        (x, skip_list, index), w1, b1, w2, b2)
    out = jax.block_until_ready(out)

    ref = jax.block_until_ready(_reference_forward(x, w1, b1, w2, b2))
    assert out.shape == (N, C, H, W)
    assert jnp.allclose(out, ref, atol=1e-4, rtol=1e-4), (
        float(jnp.max(jnp.abs(out - ref))))
    assert idx_out == index and skip_out is skip_list

    print("KERNEL_OK")
</pallas_src>

<mosaic_0001>
module attributes {stable_mosaic.version = 11 : i64} {
  func.func @probe(%arg0: memref<8x128xf32, #tpu.memory_space<vmem>>, %arg1: memref<8x128xf32, #tpu.memory_space<vmem>>) attributes {dimension_semantics = [], scalar_prefetch = 0 : i64, scratch_operands = 0 : i64, tpu.core_type = #tpu.core_type<tc>} {
    %c0 = arith.constant 0 : index
    %c0_0 = arith.constant 0 : index
    %0 = vector.load %arg0[%c0, %c0_0] : memref<8x128xf32, #tpu.memory_space<vmem>>, vector<8x128xf32>
    %c1_i32 = arith.constant 1 : i32
    %1 = tpu.dynamic_rotate %0 by %c1_i32 dim 1 : vector<8x128xf32>, i32 -> vector<8x128xf32>
    %c0_1 = arith.constant 0 : index
    %c0_2 = arith.constant 0 : index
    %2 = vector.load %arg1[%c0_1, %c0_2] : memref<8x128xf32, #tpu.memory_space<vmem>>, vector<8x128xf32>
    tpu.vector_store %arg1[%c0_1, %c0_2], %1 {strides = array<i32>} : memref<8x128xf32, #tpu.memory_space<vmem>>, vector<8x128xf32>,
    return
  }
}

</mosaic_0001>

<bundles_post_ra>
// kernel: tpu_custom_call.1
= control target key start
LH: loop header
LB: loop body
LE: loop exit
PB: predicated region body
PF: predicated region fallthrough
CT: control target
= control target key end

     0   :  { %6 = vsyncpa [#allocation3], 0  ;;  %s118_s0 = inlined_call_operand.hbm [shape: f32[8,128], index: 0, kind: input, shape index: {}]   ;;  %s119_s1 = inlined_call_operand.hbm [shape: f32[8,128], index: 1, kind: output, shape index: {}]  }
   0x1   :  { %7 = vsyncpa [#allocation4], 0  ;;  %s13_s8 = sshll.u32 %s118_s0, 4  ;;  %s99_s9 = smov [#allocation2]   ;;  %s14_s8 = int_to_ptr.hbm [resolvable:$true] %s13_s8 }
   0x2   :  { %s15_s10 = sshll.u32 %s99_s9, 4  ;;  %s16_s10 = int_to_ptr.vmem [resolvable:$true] %s15_s10 }
   0x3   :  { %18 = dma.hbm_to_vmem [thread:$0]  %s14_s8, 128, %s16_s10, [#allocation3]  }
   0x4   :  { %95 = dma.done.wait [#allocation3], 128  }
   0x5   :  { %96 = vsyncadd [#allocation3], 4294967168  ;;  %v23_v0 = vld [vmem:[#allocation2] sm:$0xff]  ;;  %s100_s11 = smov 1   ;;  %s101_s12 = smov [#allocation5]  }
   0x6   :  { %24 = vrot.lane.b32.xlu0 %v23_v0, %s100_s11  ;;  %s32_s13 = sshll.u32 %s101_s12, 4  ;;  %s34_s16 = sshll.u32 %s119_s1, 4  ;;  %s33_s13 = int_to_ptr.vmem [resolvable:$true] %s32_s13  ;;  %s35_s16 = int_to_ptr.hbm [resolvable:$true] %s34_s16 }
  0x78   :  { %v25_v1 = vpop.permute.xlu0 %24 }
  0x79   :  { %26 = vst [vmem:[#allocation5] sm:$0xff] %v25_v1 }
  0x7a   :  { %37 = dma.vmem_to_hbm [thread:$0]  %s33_s13, 128, %s35_s16, [#allocation4]  }
  0x7b   :  { %97 = dma.done.wait [#allocation4], 128  }
  0x7c   :  { %98 = vsyncadd [#allocation4], 4294967168 }
  0x7d   :  { %42 = vsyncpa [#allocation3], 1 }
  0x7e   :  { %43 = vsyncpa [#allocation4], 1 }

</bundles_post_ra>
